<compile_context>
chip_gen: v7x
topology: tpu7x:2x2x1
jax: 0.10.0
libtpu: 0.0.40
codegen_flags: <defaults>
</compile_context>

<pallas_src>
import numpy as np

import jax
import jax.numpy as jnp
from jax import lax
from jax.experimental import pallas as pl
from jax.experimental.pallas import tpu as pltpu


def _ceil_to(x, k):
    return ((x + k - 1) // k) * k


def _make_kernel(scale, margin, m_valid, tile, has_padding, precision):
    c_relu_p = 1.0 + margin      # relu(-sim + 1 + margin)  (positive pairs)
    c_relu_n = margin            # relu( sim + margin)      (negative pairs)
    c_marg_p = 1.0 - margin      # (sim - (1 - margin))
    c_marg_n = margin            # (sim - margin)

    def kernel(ri_ref, ci_ref, frow_ref, fcol_ref, labr_ref, labc_ref,
               pos_ref, neg_ref):
        k = pl.program_id(0)
        ri = ri_ref[k]                       # row-tile index (SMEM scalar)
        ci = ci_ref[k]                       # col-tile index (SMEM scalar)

        # Similarity tile: features are pre-normalized (cos) in the wrapper;
        # contract the last dim of both operands -> no transpose copy.
        sim = lax.dot_general(
            frow_ref[...], fcol_ref[...], (((1,), (1,)), ((), ())),
            precision=precision,
            preferred_element_type=jnp.float32)          # (tile, tile) f32

        eq = labr_ref[...] == labc_ref[...]              # (tile, tile) bool

        # Strict-upper-triangle / padding mask.  The grid only visits pairs
        # with ci >= ri, so the triangle test reduces to a local-iota compare
        # against a scalar per-tile offset (trivially true on interior tiles);
        # padding compares exist only when padding exists (static flag).
        row_l = lax.broadcasted_iota(jnp.int32, (tile, tile), 0)
        col_l = lax.broadcasted_iota(jnp.int32, (tile, tile), 1)
        valid = col_l + (ci - ri) * tile > row_l
        if has_padding:
            valid = jnp.logical_and(valid, row_l < m_valid - ri * tile)
            valid = jnp.logical_and(valid, col_l < m_valid - ci * tile)

        # Single fused exponent per element.
        relu_arg = jnp.where(eq, -sim, sim) + jnp.where(eq, c_relu_p, c_relu_n)
        arg = (jnp.where(eq, -scale, scale)
               * jnp.maximum(relu_arg, 0.0)
               * (sim - jnp.where(eq, c_marg_p, c_marg_n)))
        e = jnp.where(valid, jnp.exp(arg), 0.0)
        pos_e = jnp.where(eq, e, 0.0)
        neg_e = jnp.where(eq, 0.0, e)

        # Sublane-only reduction to lane-dense (1, tile) partials; accumulate
        # into the resident output blocks (first-step init via select — no
        # conditionals in the kernel).
        part_p = jnp.sum(pos_e, axis=0, keepdims=True)
        part_n = jnp.sum(neg_e, axis=0, keepdims=True)
        first = k == 0
        pos_ref[...] = jnp.where(first, part_p, pos_ref[...] + part_p)
        neg_ref[...] = jnp.where(first, part_n, neg_ref[...] + part_n)

    return kernel


def circle_loss(feats, labels, *, scale=32.0, margin=0.25,
                similarity="cos", block=512, mxu_bf16=False):
    """Pallas TPU forward of CircleLoss."""
    m, d = feats.shape
    assert labels.shape[0] == m, (feats.shape, labels.shape)
    assert block % 128 == 0

    feats = feats.astype(jnp.float32)
    labels = labels.astype(jnp.int32)

    if similarity == "cos":
        # F.normalize: x / max(||x||_2, 1e-12), hoisted out of the grid.
        norms = jnp.sqrt(jnp.sum(feats * feats, axis=-1, keepdims=True))
        feats = feats / jnp.maximum(norms, 1e-12)
    elif similarity != "dot":
        raise ValueError("This similarity is not implemented.")

    if mxu_bf16:
        # Optional: halves HBM streaming of the re-read column blocks.  Off by
        # default because scale=32 in the exponent amplifies bf16 sim error.
        feats = feats.astype(jnp.bfloat16)
        precision = None
    else:
        precision = lax.Precision.HIGHEST

    # Square tiles; shrink so double-buffered inputs + (tile, tile) f32
    # temporaries stay within a conservative VMEM budget (v7x: 64 MiB phys).
    if m <= block:
        tile = max(_ceil_to(m, 8), 8)
    else:
        tile = block
        itemsize = jnp.dtype(feats.dtype).itemsize
        while tile > 128 and (4 * tile * d * itemsize
                              + 8 * tile * tile * 4) > 24 * 1024 * 1024:
            tile //= 2

    m_pad = _ceil_to(m, tile)
    has_padding = m_pad != m
    if has_padding:
        feats = jnp.pad(feats, ((0, m_pad - m), (0, 0)))
        labels = jnp.pad(labels, (0, m_pad - m), constant_values=-1)

    labels_col = labels.reshape(m_pad, 1)   # row-block labels (sublane axis)
    labels_row = labels.reshape(1, m_pad)   # col-block labels (lane axis)

    # 1-D grid over upper-triangular tile pairs only (ci >= ri).  Row-major
    # order keeps the row block resident while its column blocks stream.
    n_tiles = m_pad // tile
    ri_np, ci_np = np.triu_indices(n_tiles)
    ri_idx = jnp.asarray(ri_np, dtype=jnp.int32)
    ci_idx = jnp.asarray(ci_np, dtype=jnp.int32)
    n_pairs = int(ri_np.shape[0])

    kernel = _make_kernel(float(scale), float(margin), m, tile, has_padding,
                          precision)
    pos_part, neg_part = pl.pallas_call(
        kernel,
        out_shape=(jax.ShapeDtypeStruct((1, tile), jnp.float32),
                   jax.ShapeDtypeStruct((1, tile), jnp.float32)),
        grid_spec=pltpu.PrefetchScalarGridSpec(
            num_scalar_prefetch=2,
            grid=(n_pairs,),
            in_specs=[
                pl.BlockSpec((tile, d), lambda k, ri, ci: (ri[k], 0)),   # row feats
                pl.BlockSpec((tile, d), lambda k, ri, ci: (ci[k], 0)),   # col feats
                pl.BlockSpec((tile, 1), lambda k, ri, ci: (ri[k], 0)),   # row labels
                pl.BlockSpec((1, tile), lambda k, ri, ci: (0, ci[k])),   # col labels
            ],
            out_specs=[
                pl.BlockSpec((1, tile), lambda k, ri, ci: (0, 0)),
                pl.BlockSpec((1, tile), lambda k, ri, ci: (0, 0)),
            ],
        ),
        compiler_params=pltpu.CompilerParams(
            dimension_semantics=("arbitrary",),
            vmem_limit_bytes=48 * 1024 * 1024),
    )(ri_idx, ci_idx, feats, feats, labels_col, labels_row)

    return jnp.log(1.0 + jnp.sum(pos_part) * jnp.sum(neg_part))


def circle_loss_ref(feats, labels, *, scale=32.0, margin=0.25):
    """Pure-JAX reference mirroring the PyTorch module (similarity='cos')."""
    feats = feats.astype(jnp.float32)
    m = feats.shape[0]
    eq = labels[:, None] == labels[None, :]
    upper = jnp.triu(jnp.ones((m, m), dtype=bool), k=1)
    norm = jnp.maximum(jnp.linalg.norm(feats, axis=-1, keepdims=True), 1e-12)
    fn = feats / norm
    sim = jnp.matmul(fn, fn.T, precision=lax.Precision.HIGHEST)
    alpha_p = jax.nn.relu(-sim + 1.0 + margin)
    alpha_n = jax.nn.relu(sim + margin)
    term_p = jnp.where(eq & upper,
                       jnp.exp(-scale * alpha_p * (sim - (1.0 - margin))), 0.0)
    term_n = jnp.where((~eq) & upper,
                       jnp.exp(scale * alpha_n * (sim - margin)), 0.0)
    return jnp.log(1.0 + jnp.sum(term_p) * jnp.sum(term_n))


if __name__ == "__main__":
    key = jax.random.PRNGKey(0)
    k1, k2, k3, k4 = jax.random.split(key, 4)

    # 1) Small single-tile case (matches the module's typical tiny smoke test).
    feats = jax.random.normal(k1, (8, 32), dtype=jnp.float32)
    labels = jax.random.randint(k2, (8,), 0, 4, dtype=jnp.int32)
    loss = jax.block_until_ready(circle_loss(feats, labels, scale=32.0, margin=0.25))
    ref = circle_loss_ref(feats, labels, scale=32.0, margin=0.25)
    assert jnp.allclose(loss, ref, rtol=1e-3, atol=1e-3), (loss, ref)

    # 2) Multi-tile case exercising the upper-triangular pair grid + padding
    #    (m=300 with 128-wide tiles -> 3x3 tile grid, 6 visited pairs).
    feats2 = jax.random.normal(k3, (300, 32), dtype=jnp.float32)
    labels2 = jax.random.randint(k4, (300,), 0, 16, dtype=jnp.int32)
    loss2 = jax.block_until_ready(
        circle_loss(feats2, labels2, scale=32.0, margin=0.25, block=128))
    ref2 = circle_loss_ref(feats2, labels2, scale=32.0, margin=0.25)
    assert jnp.allclose(loss2, ref2, rtol=1e-3, atol=1e-3), (loss2, ref2)

    print("KERNEL_OK")
</pallas_src>

<mosaic_0001>
module attributes {stable_mosaic.version = 11 : i64} {
  func.func @kernel(%arg0: i32, %arg1: memref<1xi32, #tpu.memory_space<smem>>, %arg2: memref<1xi32, #tpu.memory_space<smem>>, %arg3: memref<8x32xf32, #tpu.memory_space<vmem>>, %arg4: memref<8x32xf32, #tpu.memory_space<vmem>>, %arg5: memref<8x1xi32, #tpu.memory_space<vmem>>, %arg6: memref<1x8xi32, #tpu.memory_space<vmem>>, %arg7: memref<1x8xf32, #tpu.memory_space<vmem>>, %arg8: memref<1x8xf32, #tpu.memory_space<vmem>>) attributes {dimension_semantics = [#tpu.dimension_semantics<arbitrary>], iteration_bounds = array<i64: 1>, scalar_prefetch = 2 : i64, scratch_operands = 0 : i64, tpu.core_type = #tpu.core_type<tc>, window_params = [{transform_indices = @transform_0, window_bounds = array<i64: 8, 32>}, {transform_indices = @transform_1, window_bounds = array<i64: 8, 32>}, {transform_indices = @transform_2, window_bounds = array<i64: 8, 1>}, {transform_indices = @transform_3, window_bounds = array<i64: 1, 8>}, {pipeline_mode = #tpu.pipeline_mode<synchronous>, transform_indices = @transform_4, window_bounds = array<i64: 1, 8>}, {pipeline_mode = #tpu.pipeline_mode<synchronous>, transform_indices = @transform_5, window_bounds = array<i64: 1, 8>}]} {
    %0 = arith.index_cast %arg0 : i32 to index
    %1 = memref.load %arg1[%0] : memref<1xi32, #tpu.memory_space<smem>>
    %2 = arith.index_cast %arg0 : i32 to index
    %3 = memref.load %arg2[%2] : memref<1xi32, #tpu.memory_space<smem>>
    %c0 = arith.constant 0 : index
    %c0_0 = arith.constant 0 : index
    %4 = vector.load %arg3[%c0, %c0_0] : memref<8x32xf32, #tpu.memory_space<vmem>>, vector<8x32xf32>
    %c0_1 = arith.constant 0 : index
    %c0_2 = arith.constant 0 : index
    %5 = vector.load %arg4[%c0_1, %c0_2] : memref<8x32xf32, #tpu.memory_space<vmem>>, vector<8x32xf32>
    %cst = arith.constant dense<0.000000e+00> : vector<8x8xf32>
    %6 = tpu.matmul %4, %5, %cst {dimension_numbers = #tpu.dot_dimension_numbers<[1], [1], [0], [0], [0, 0, 1, 0], [], []>, precision = #tpu.contract_precision<fp32>} : vector<8x32xf32>, vector<8x32xf32>, vector<8x8xf32> -> vector<8x8xf32>
    %c0_3 = arith.constant 0 : index
    %c0_4 = arith.constant 0 : index
    %7 = vector.load %arg5[%c0_3, %c0_4] : memref<8x1xi32, #tpu.memory_space<vmem>>, vector<8x1xi32>
    %c0_5 = arith.constant 0 : index
    %c0_6 = arith.constant 0 : index
    %8 = vector.load %arg6[%c0_5, %c0_6] : memref<1x8xi32, #tpu.memory_space<vmem>>, vector<1x8xi32>
    %9 = vector.broadcast %7 : vector<8x1xi32> to vector<8x8xi32>
    %10 = vector.broadcast %8 : vector<1x8xi32> to vector<8x8xi32>
    %11 = arith.cmpi eq, %9, %10 : vector<8x8xi32>
    %12 = tpu.iota {dimensions = array<i32: 0>} : vector<8x8xi32>
    %13 = tpu.iota {dimensions = array<i32: 1>} : vector<8x8xi32>
    %14 = arith.subi %3, %1 : i32
    %c8_i32 = arith.constant 8 : i32
    %15 = arith.muli %14, %c8_i32 : i32
    %16 = vector.broadcast %15 : i32 to vector<8x8xi32>
    %17 = arith.addi %13, %16 : vector<8x8xi32>
    %18 = arith.cmpi sgt, %17, %12 : vector<8x8xi32>
    %cst_7 = arith.constant 0.000000e+00 : f32
    %19 = vector.broadcast %cst_7 : f32 to vector<8x8xf32>
    %20 = arith.subf %19, %6 : vector<8x8xf32>
    %21 = arith.select %11, %20, %6 : vector<8x8xi1>, vector<8x8xf32>
    %cst_8 = arith.constant 1.250000e+00 : f32
    %cst_9 = arith.constant 2.500000e-01 : f32
    %22 = vector.broadcast %cst_8 : f32 to vector<8x8xf32>
    %23 = vector.broadcast %cst_9 : f32 to vector<8x8xf32>
    %24 = arith.select %11, %22, %23 : vector<8x8xi1>, vector<8x8xf32>
    %25 = arith.addf %21, %24 : vector<8x8xf32>
    %cst_10 = arith.constant -3.200000e+01 : f32
    %cst_11 = arith.constant 3.200000e+01 : f32
    %26 = vector.broadcast %cst_10 : f32 to vector<8x8xf32>
    %27 = vector.broadcast %cst_11 : f32 to vector<8x8xf32>
    %28 = arith.select %11, %26, %27 : vector<8x8xi1>, vector<8x8xf32>
    %cst_12 = arith.constant 0.000000e+00 : f32
    %29 = vector.broadcast %cst_12 : f32 to vector<8x8xf32>
    %30 = arith.maximumf %25, %29 : vector<8x8xf32>
    %31 = arith.mulf %28, %30 : vector<8x8xf32>
    %cst_13 = arith.constant 7.500000e-01 : f32
    %cst_14 = arith.constant 2.500000e-01 : f32
    %32 = vector.broadcast %cst_13 : f32 to vector<8x8xf32>
    %33 = vector.broadcast %cst_14 : f32 to vector<8x8xf32>
    %34 = arith.select %11, %32, %33 : vector<8x8xi1>, vector<8x8xf32>
    %35 = arith.subf %6, %34 : vector<8x8xf32>
    %36 = arith.mulf %31, %35 : vector<8x8xf32>
    %37 = math.exp %36 : vector<8x8xf32>
    %cst_15 = arith.constant 0.000000e+00 : f32
    %38 = vector.broadcast %cst_15 : f32 to vector<8x8xf32>
    %39 = arith.select %18, %37, %38 : vector<8x8xi1>, vector<8x8xf32>
    %cst_16 = arith.constant 0.000000e+00 : f32
    %40 = vector.broadcast %cst_16 : f32 to vector<8x8xf32>
    %41 = arith.select %11, %39, %40 : vector<8x8xi1>, vector<8x8xf32>
    %cst_17 = arith.constant 0.000000e+00 : f32
    %42 = vector.broadcast %cst_17 : f32 to vector<8x8xf32>
    %43 = arith.select %11, %42, %39 : vector<8x8xi1>, vector<8x8xf32>
    %cst_18 = arith.constant dense<0.000000e+00> : vector<8xf32>
    %44 = vector.multi_reduction <add>, %41, %cst_18 [0] : vector<8x8xf32> to vector<8xf32>
    %45 = vector.shape_cast %44 : vector<8xf32> to vector<1x8xf32>
    %cst_19 = arith.constant dense<0.000000e+00> : vector<8xf32>
    %46 = vector.multi_reduction <add>, %43, %cst_19 [0] : vector<8x8xf32> to vector<8xf32>
    %47 = vector.shape_cast %46 : vector<8xf32> to vector<1x8xf32>
    %c0_i32 = arith.constant 0 : i32
    %48 = arith.cmpi eq, %arg0, %c0_i32 : i32
    %c0_20 = arith.constant 0 : index
    %c0_21 = arith.constant 0 : index
    %49 = vector.load %arg7[%c0_20, %c0_21] : memref<1x8xf32, #tpu.memory_space<vmem>>, vector<1x8xf32>
    %50 = arith.addf %49, %45 : vector<1x8xf32>
    %51 = arith.select %48, %45, %50 : vector<1x8xf32>
    %c0_22 = arith.constant 0 : index
    %c0_23 = arith.constant 0 : index
    %52 = vector.load %arg7[%c0_22, %c0_23] : memref<1x8xf32, #tpu.memory_space<vmem>>, vector<1x8xf32>
    tpu.vector_store %arg7[%c0_22, %c0_23], %51 {strides = array<i32>} : memref<1x8xf32, #tpu.memory_space<vmem>>, vector<1x8xf32>,
    %c0_24 = arith.constant 0 : index
    %c0_25 = arith.constant 0 : index
    %53 = vector.load %arg8[%c0_24, %c0_25] : memref<1x8xf32, #tpu.memory_space<vmem>>, vector<1x8xf32>
    %54 = arith.addf %53, %47 : vector<1x8xf32>
    %55 = arith.select %48, %47, %54 : vector<1x8xf32>
    %c0_26 = arith.constant 0 : index
    %c0_27 = arith.constant 0 : index
    %56 = vector.load %arg8[%c0_26, %c0_27] : memref<1x8xf32, #tpu.memory_space<vmem>>, vector<1x8xf32>
    tpu.vector_store %arg8[%c0_26, %c0_27], %55 {strides = array<i32>} : memref<1x8xf32, #tpu.memory_space<vmem>>, vector<1x8xf32>,
    return
  }
  func.func @transform_0(%arg0: i32, %arg1: memref<1xi32, #tpu.memory_space<smem>>, %arg2: memref<1xi32, #tpu.memory_space<smem>>) -> (i32, i32) {
    %0 = arith.index_cast %arg0 : i32 to index
    %1 = memref.load %arg1[%0] : memref<1xi32, #tpu.memory_space<smem>>
    %c0_i32 = arith.constant 0 : i32
    %c0_i32_0 = arith.constant 0 : i32
    return %1, %c0_i32 : i32, i32
  }
  func.func @transform_1(%arg0: i32, %arg1: memref<1xi32, #tpu.memory_space<smem>>, %arg2: memref<1xi32, #tpu.memory_space<smem>>) -> (i32, i32) {
    %0 = arith.index_cast %arg0 : i32 to index
    %1 = memref.load %arg2[%0] : memref<1xi32, #tpu.memory_space<smem>>
    %c0_i32 = arith.constant 0 : i32
    %c0_i32_0 = arith.constant 0 : i32
    return %1, %c0_i32 : i32, i32
  }
  func.func @transform_2(%arg0: i32, %arg1: memref<1xi32, #tpu.memory_space<smem>>, %arg2: memref<1xi32, #tpu.memory_space<smem>>) -> (i32, i32) {
    %0 = arith.index_cast %arg0 : i32 to index
    %1 = memref.load %arg1[%0] : memref<1xi32, #tpu.memory_space<smem>>
    %c0_i32 = arith.constant 0 : i32
    %c0_i32_0 = arith.constant 0 : i32
    return %1, %c0_i32 : i32, i32
  }
  func.func @transform_3(%arg0: i32, %arg1: memref<1xi32, #tpu.memory_space<smem>>, %arg2: memref<1xi32, #tpu.memory_space<smem>>) -> (i32, i32) {
    %0 = arith.index_cast %arg0 : i32 to index
    %1 = memref.load %arg2[%0] : memref<1xi32, #tpu.memory_space<smem>>
    %c0_i32 = arith.constant 0 : i32
    %c0_i32_0 = arith.constant 0 : i32
    return %c0_i32, %1 : i32, i32
  }
  func.func @transform_4(%arg0: i32, %arg1: memref<1xi32, #tpu.memory_space<smem>>, %arg2: memref<1xi32, #tpu.memory_space<smem>>) -> (i32, i32) {
    %c0_i32 = arith.constant 0 : i32
    %c0_i32_0 = arith.constant 0 : i32
    %c0_i32_1 = arith.constant 0 : i32
    return %c0_i32, %c0_i32_0 : i32, i32
  }
  func.func @transform_5(%arg0: i32, %arg1: memref<1xi32, #tpu.memory_space<smem>>, %arg2: memref<1xi32, #tpu.memory_space<smem>>) -> (i32, i32) {
    %c0_i32 = arith.constant 0 : i32
    %c0_i32_0 = arith.constant 0 : i32
    %c0_i32_1 = arith.constant 0 : i32
    return %c0_i32, %c0_i32_0 : i32, i32
  }
}

</mosaic_0001>

<bundles_post_ra>
// kernel: tpu_custom_call.1
= control target key start
LH: loop header
LB: loop body
LE: loop exit
PB: predicated region body
PF: predicated region fallthrough
CT: control target
= control target key end

     0   :  { %15 = vsyncpa [#allocation6], 0  ;;  %v772_v0 = vmov 0.0   ;;  %s907_s0 = inlined_call_operand.<no memory space> [shape: s32[1], index: 0, kind: input, shape index: {}]   ;;  %s908_s1 = inlined_call_operand.<no memory space> [shape: s32[1], index: 1, kind: input, shape index: {}]   ;;  %s909_s2 = inlined_call_operand.vmem [shape: f32[8,32], index: 2, kind: input, shape index: {}]   ;;  %s910_s3 = inlined_call_operand.vmem [shape: f32[8,32], index: 3, kind: input, shape index: {}]   ;;  %s911_s4 = inlined_call_operand.vmem [shape: s32[8,1], index: 4, kind: input, shape index: {}]   ;;  %s912_s5 = inlined_call_operand.vmem [shape: s32[1,8], index: 5, kind: input, shape index: {}]   ;;  %s913_s6 = inlined_call_operand.hbm [shape: f32[1,8], index: 6, kind: output, shape index: {0}]   ;;  %s914_s7 = inlined_call_operand.hbm [shape: f32[1,8], index: 7, kind: output, shape index: {1}]  }
   0x1   :  { %p74_p0 = scmp.lt.s32.totalorder %s908_s1, 0  ;;  %p68_p1 = scmp.lt.s32.totalorder %s907_s0, 0  ;;  %690 = vmatprep.subr.mxu0 %v772_v0  ;;  %675 = vmatprep.subr.mxu1 %v772_v0 }
   0x2   :  { %16 = vsyncpa [#allocation8], 0  ;;  %vm773_vm0 = vmmov 0   ;;  %v774_v1 = vmov 0   ;;  %vm94_vm1 = vcmask 261120   ;;  %v775_v26 = vmov 0.25   ;;  %s561_s25 = ssub.s32 %s908_s1, %s907_s0 }
   0x3   :  { %s828_s30 = scalar_select %p74_p0, %s908_s1, 0  ;;  %692 = vmatprep.mubr.msk.f32.mxu0 %vm773_vm0, %v772_v0  ;;  %677 = vmatprep.mubr.msk.f32.mxu1 %vm773_vm0, %v772_v0  ;;  %v776_v32 = vmov 32.0   ;;  %v557_v37 = vlaneseq  ;;  %vm581_vm4 = vcmask 64512   ;;  %vm603_vm5 = vcmask 57344  }
   0x4   :  { %s69_s10 = scalar_select %p68_p1, %s907_s0, 0  ;;  %721 = vset.pattern.permute.xlu0 %v774_v1 }
   0x5   :  { %s659_s11 = sshll.u32 %s828_s30, 3  ;;  %s662_s26 = sshll.u32 %s561_s25, 3  ;;  %v560_v39 = vand.u32 127, %v557_v37  ;;  %v558_v41 = vshrl.u32 %v557_v37, 7 }
   0x6   :  { %s77_s14 = scalar_lea.vmem %s910_s3, %s659_s11  ;;  %s658_s15 = sshll.u32 %s69_s10, 3  ;;  %v563_v40 = vstv %s662_s26 }
   0x7   :  { %v93_v2 = vld [vmem:[%s77_s14] sm:$0xff]  ;;  %s71_s18 = scalar_lea.vmem %s909_s2, %s658_s15  ;;  %s83_s21 = scalar_lea.vmem %s911_s4, %s658_s15  ;;  %v564_v42 = vadd.s32 %v563_v40, %v560_v39 }
   0x8   :  { %v99_v3 = vsel %vm94_vm1, %v93_v2, 0  ;;  %v92_v4 = vld [vmem:[%s71_s18] sm:$0xff]  ;;  %s88_s4 = scalar_lea.vmem %s912_s5, %s828_s30  ;;  %s777_s0 = smov [#allocation5]  }
   0x9   :  { %v547_v5 = vld [vmem:[%s83_s21] sm:$0xff]  ;;  %v102_v6 = vand.u32 4294901760, %v99_v3  ;;  %v96_v7 = vsel %vm94_vm1, %v92_v4, 0  ;;  %vm565_vm3 = vcmp.gt.s32.totalorder %v564_v42, %v558_v41  ;;  %s615_s1 = sshll.u32 %s777_s0, 4  ;;  %s778_s27 = smov [#allocation7]   ;;  %s616_s1 = int_to_ptr.vmem [resolvable:$true] %s615_s1 }
   0xa   :  { %550 = vperm.xlu0 %721, %v547_v5   ;;  %v167_v8 = vand.u32 4294901760, %v96_v7  ;;  %v661_v19 = vld [vmem:[%s88_s4] ss:$0 sm:$0xff]  ;;  %s625_s28 = sshll.u32 %s778_s27, 4  ;;  %s724_s29 = scalar_lea.vmem %s616_s1, 16  ;;  %s875_s28 = int_to_ptr.vmem [resolvable:$true] %s625_s28 }
   0xb   :  { %v179_v9 = vsub.f32 %v99_v3, %v102_v6  ;;  %691 = vmatpush3.xpose.msra.mxu0 %v102_v6  ;;  %676 = vmatpush3.xpose.msra.mxu1 %v102_v6  ;;  %p725_p2 = scmp.ne.s32.totalorder %s616_s1, %s724_s29  ;;  %s728_s30 = scalar_lea.vmem %s616_s1, 32 }
   0xc   :  { %v168_v10 = vsub.f32 %v96_v7, %v167_v8  ;;  %680 = vmatprep.subr.mxu1 %v772_v0  ;;  %695 = vmatprep.subr.mxu0 %v772_v0  ;;  %p729_p3 = scmp.lt.s32.totalorder %s616_s1, %s616_s1  ;;  %p730_p4 = scmp.lt.s32.totalorder %s728_s30, %s724_s29 }
   0xd   :  { %v180_v11 = vand.u32 4294901760, %v179_v9 }
   0xe   :  { %v169_v12 = vand.u32 4294901760, %v168_v10  ;;  %p731_p5 = por %p730_p4, %p729_p3 }
   0xf   :  { %v181_v13 = vsub.f32 %v179_v9, %v180_v11 }
  0x10   :  { %693 = vmatmul.mubr.f32.vlgmr.msra.gmra.mrb[0].mxu0 %v169_v12  ;;  %v170_v14 = vsub.f32 %v168_v10, %v169_v12  ;;  %p732_p6 = pnand %p731_p5, %p725_p2 }
  0x11   :  { %v182_v15 = vand.u32 4294901760, %v181_v13  ;;  %696 = vmatpush3.xpose.msra.mxu0 %v180_v11  ;;  %697 = vmatprep.mubr.msk.f32.mxu0 %vm773_vm0, %v772_v0 }
  0x12   :  { %v171_v16 = vand.u32 4294901760, %v170_v14  ;;  %700 = vmatprep.subr.mxu0 %v772_v0 }
  0x14   :  { %678 = vmatmul.mubr.f32.vlgmr.msra.gmra.mrb[0].mxu1 %v171_v16 }
  0x15   :  { %681 = vmatpush3.xpose.msra.mxu1 %v182_v15  ;;  %682 = vmatprep.mubr.msk.f32.mxu1 %vm773_vm0, %v772_v0 }
  0x16   :  { %685 = vmatprep.subr.mxu1 %v772_v0 }
  0x18   :  { %698 = vmatmul.mubr.f32.vlgmr.msra.gmra.mrb[0].mxu0 %v167_v8 }
  0x19   :  { %701 = vmatpush3.xpose.msra.mxu0 %v102_v6  ;;  %702 = vmatprep.mubr.msk.f32.mxu0 %vm773_vm0, %v772_v0 }
  0x1c   :  { %683 = vmatmul.mubr.f32.vlgmr.msra.gmra.mrb[0].mxu1 %v167_v8 }
  0x1d   :  { %686 = vmatpush3.xpose.msra.mxu1 %v179_v9  ;;  %687 = vmatprep.mubr.msk.f32.mxu1 %vm773_vm0, %v772_v0 }
  0x20   :  { %703 = vmatmul.mubr.f32.vlgmr.msra.gmra.mrb[0].mxu0 %v167_v8 }
  0x24   :  { %688 = vmatmul.mubr.f32.vlgmr.msra.gmra.mrb[0].mxu1 %v168_v10 }
  0x89   :  { %v551_v20 = vpop.permute.xlu0 %550 }
  0x8a   :  { %vm853_vm2 = vcmp.eq.s32.totalorder %v551_v20, %v661_v19 }
  0x8b   :  { %v568_v27 = vsel %vm853_vm2, 1.25, %v775_v26  ;;  %v573_v30 = vsel %vm853_vm2, 0.75, %v775_v26  ;;  %v570_v33 = vsel %vm853_vm2, -32.0, %v776_v32 }
  0xf3   :  { %v543_v17 = vpop.f32.mrb[0].mxu0 }
  0xf4   :  { %v704_v18 = vpop.f32.mrb[1].mxu0 }
  0xf7   :  { %v323_v21 = vpop.f32.mrb[0].mxu1 }
  0xf8   :  { %v705_v22 = vadd.f32 %v543_v17, %v323_v21  ;;  %v689_v23 = vpop.f32.mrb[1].mxu1 }
  0xfa   :  { %v566_v25 = vsub.f32 0.0, %v705_v22  ;;  %v574_v35 = vsub.f32 %v705_v22, %v573_v30 }
  0xfc   :  { %v567_v28 = vsel %vm853_vm2, %v566_v25, %v705_v22 }
  0xfd   :  { %v569_v29 = vadd.f32 %v568_v27, %v567_v28 }
  0xff   :  { %v571_v31 = vmax.f32 %v569_v29, 0.0 }
 0x101   :  { %v572_v34 = vmul.f32 %v571_v31, %v570_v33 }
 0x103   :  { %v575_v36 = vmul.f32 %v574_v35, %v572_v34 }
 0x105   :  { %v576_v38 = vmul.f32 1.442695, %v575_v36 }
 0x107   :  { %722 = vpow2.f32 %v576_v38 }
 0x111   :  { %v723_v43 = vpop.eup %722 }
 0x112   :  { %v578_v44 = vsel %vm565_vm3, %v723_v43, 0.0 }
 0x113   :  { %v579_v45 = vsel %vm853_vm2, %v578_v44, 0.0  ;;  %v580_v46 = vsel %vm853_vm2, 0.0, %v578_v44 }
 0x114   :  { %v582_v47 = vsel %vm581_vm4, %v579_v45, 0.0  ;;  %v589_v48 = vsel %vm581_vm4, %v580_v46, 0.0 }
 0x115   :  { %v583_v49 = vrot.slane %v582_v47, 4  ;;  %v590_v50 = vrot.slane %v589_v48, 4 }
 0x117   :  { %v584_v51 = vadd.f32 %v583_v49, %v582_v47  ;;  %v591_v52 = vadd.f32 %v590_v50, %v589_v48 }
 0x119   :  { %v585_v53 = vrot.slane %v584_v51, 2  ;;  %v592_v54 = vrot.slane %v591_v52, 2 }
 0x11b   :  { %v586_v55 = vadd.f32 %v585_v53, %v584_v51  ;;  %v593_v56 = vadd.f32 %v592_v54, %v591_v52 }
 0x11d   :  { %v587_v57 = vrot.slane %v586_v55, 1  ;;  %v594_v58 = vrot.slane %v593_v56, 1 }
 0x11f   :  { %v588_v59 = vadd.f32 %v587_v57, %v586_v55  ;;  %v595_v60 = vadd.f32 %v594_v58, %v593_v56 }
 0x121   :  { %604 = vst.msk [vmem:[#allocation5] sm:$0x1] %vm603_vm5, %v588_v59  ;;  %608 = vst.msk [vmem:[#allocation7] sm:$0x1] %vm603_vm5, %v595_v60 }
 0x122   :  { %735 = shalt.err (!%p732_p6)
}
 0x123   :  { %s736_s10 = scalar_lea.hbm %s913_s6, 16 }
 0x124   :  { %p737_p7 = scmp.ne.s32.totalorder %s913_s6, %s736_s10  ;;  %p740_p8 = scmp.lt.u32.totalorder %s736_s10, %s913_s6 }
 0x126   :  { %p742_p9 = pnand %p740_p8, %p737_p7 }
 0x128   :  { %745 = shalt.err (!%p742_p9)
}
 0x129   :  { %618 = dma.vmem_to_hbm [thread:$0]  %s616_s1, 16, %s913_s6, [#allocation6]  }
 0x12a   :  { %s746_s17 = scalar_lea.vmem %s875_s28, 16  ;;  %s750_s18 = scalar_lea.vmem %s875_s28, 32 }
 0x12b   :  { %p747_p10 = scmp.ne.s32.totalorder %s875_s28, %s746_s17  ;;  %p751_p11 = scmp.lt.s32.totalorder %s875_s28, %s875_s28 }
 0x12c   :  { %p752_p12 = scmp.lt.s32.totalorder %s750_s18, %s746_s17 }
 0x12e   :  { %p753_p13 = por %p752_p12, %p751_p11 }
 0x130   :  { %p754_p0 = pnand %p753_p13, %p747_p10 }
 0x132   :  { %757 = shalt.err (!%p754_p0)
}
 0x133   :  { %s758_s21 = scalar_lea.hbm %s914_s7, 16 }
 0x134   :  { %p759_p1 = scmp.ne.s32.totalorder %s914_s7, %s758_s21  ;;  %p762_p2 = scmp.lt.u32.totalorder %s758_s21, %s914_s7 }
 0x136   :  { %p764_p3 = pnand %p762_p2, %p759_p1 }
 0x138   :  { %767 = shalt.err (!%p764_p3)
}
 0x139   :  { %628 = dma.vmem_to_hbm [thread:$0]  %s875_s28, 16, %s914_s7, [#allocation8]  }
 0x13a   :  { %768 = dma.done.wait [#allocation6], 16  }
 0x13b   :  { %769 = vsyncadd [#allocation6], 4294967280 }
 0x13c   :  { %770 = dma.done.wait [#allocation8], 16  }
 0x13d   :  { %771 = vsyncadd [#allocation8], 4294967280 }
 0x13e   :  { %635 = vsyncpa [#allocation6], 1 }
 0x13f   :  { %636 = vsyncpa [#allocation8], 1 }

</bundles_post_ra>
